<compile_context>
chip_gen: v7x
topology: tpu7x:2x2x1
jax: 0.10.0
libtpu: 0.0.40
codegen_flags: <defaults>
</compile_context>

<pallas_src>
import jax
import jax.numpy as jnp
import numpy as np
from jax.experimental import pallas as pl
from jax.experimental.pallas import tpu as pltpu

# TODO(synk): the frozen DINO ViT backbone (get_intermediate_feat) needs external
# pretrained weights and is not translatable here; the kernel consumes its patch
# features `image_feat` (B, n_feats, H, W) directly.
# TODO(synk): Dropout2d(p=0.1) is identity at inference and is omitted (no
# stochastic op in the kernel).


def _heads_kernel(x_ref, w1_ref, b1_ref, w2_ref, b2_ref, w3_ref, b3_ref,
                  obg_ref, oc_ref):
    # x_ref:  (1, D, HW)   one batch element; spatial (HW) in the lane axis
    # w1_ref: (2, dim, D)  linear-head 1x1-conv weights  [0]=BG, [1]=C
    # b1_ref: (2, dim, 1)
    # w2_ref: (2, D, D)    nonlinear-head hidden 1x1-conv weights
    # b2_ref: (2, D, 1)
    # w3_ref: (2, dim, D)  nonlinear-head output 1x1-conv weights
    # b3_ref: (2, dim, 1)
    # obg_ref/oc_ref: (1, dim, HW)  lane-dense outputs
    x = x_ref[0]                                     # (D, HW)
    outs = (obg_ref, oc_ref)
    for h in range(2):                               # static unroll: BG head, C head
        # linear clusterer: 1x1 conv == channel matmul with HW in lanes (MXU)
        lin = jnp.dot(w1_ref[h], x,
                      preferred_element_type=jnp.float32) + b1_ref[h]   # (dim, HW)
        # nonlinear clusterer: conv -> relu -> conv
        hid = jnp.maximum(
            jnp.dot(w2_ref[h], x,
                    preferred_element_type=jnp.float32) + b2_ref[h], 0.0)  # (D, HW)
        nl = jnp.dot(w3_ref[h], hid,
                     preferred_element_type=jnp.float32) + b3_ref[h]    # (dim, HW)
        outs[h][0] = (lin + nl).astype(outs[h].dtype)


def dino_featurizer_heads(image_feat,
                          w1bg, b1bg, w2bg, b2bg, w3bg, b3bg,
                          w1c, b1c, w2c, b2c, w3c, b3c):
    """image_feat: (B, n_feats, H, W).  Conv weights are (out_ch, in_ch) (PyTorch
    Conv2d 1x1 weights squeezed), biases are (out_ch,).
    Returns (image_feat, codeBG, codeC) with code*: (B, dim, H, W)."""
    B, D, H, W = image_feat.shape
    dim = w1bg.shape[0]
    HW = H * W

    # Free, contiguous reshape of NCHW: spatial goes to the lane axis.
    x = image_feat.reshape(B, D, HW)

    # Stack per-head weights along a leading axis of 2 (BG, C).
    w1 = jnp.stack([w1bg, w1c])                      # (2, dim, D)
    b1 = jnp.stack([b1bg, b1c])[:, :, None]          # (2, dim, 1)
    w2 = jnp.stack([w2bg, w2c])                      # (2, D, D)
    b2 = jnp.stack([b2bg, b2c])[:, :, None]          # (2, D, 1)
    w3 = jnp.stack([w3bg, w3c])                      # (2, dim, D)
    b3 = jnp.stack([b3bg, b3c])[:, :, None]          # (2, dim, 1)

    codeBG, codeC = pl.pallas_call(
        _heads_kernel,
        out_shape=(jax.ShapeDtypeStruct((B, dim, HW), image_feat.dtype),
                   jax.ShapeDtypeStruct((B, dim, HW), image_feat.dtype)),
        grid=(B,),
        in_specs=[
            pl.BlockSpec((1, D, HW), lambda b: (b, 0, 0)),
            pl.BlockSpec((2, dim, D), lambda b: (0, 0, 0)),
            pl.BlockSpec((2, dim, 1), lambda b: (0, 0, 0)),
            pl.BlockSpec((2, D, D), lambda b: (0, 0, 0)),
            pl.BlockSpec((2, D, 1), lambda b: (0, 0, 0)),
            pl.BlockSpec((2, dim, D), lambda b: (0, 0, 0)),
            pl.BlockSpec((2, dim, 1), lambda b: (0, 0, 0)),
        ],
        out_specs=(pl.BlockSpec((1, dim, HW), lambda b: (b, 0, 0)),
                   pl.BlockSpec((1, dim, HW), lambda b: (b, 0, 0))),
        compiler_params=pltpu.CompilerParams(dimension_semantics=("parallel",)),
    )(x, w1, b1, w2, b2, w3, b3)

    codeBG = codeBG.reshape(B, dim, H, W)            # free, contiguous
    codeC = codeC.reshape(B, dim, H, W)
    return image_feat, codeBG, codeC


def reference(image_feat,
              w1bg, b1bg, w2bg, b2bg, w3bg, b3bg,
              w1c, b1c, w2c, b2c, w3c, b3c):
    """Pure-JAX reference with identical math (dropout == identity at eval)."""
    def conv1x1(t, w, b):
        return jnp.einsum('bihw,oi->bohw', t, w) + b[None, :, None, None]

    def head(t, w1, b1, w2, b2, w3, b3):
        lin = conv1x1(t, w1, b1)
        hid = jax.nn.relu(conv1x1(t, w2, b2))
        return lin + conv1x1(hid, w3, b3)

    codeBG = head(image_feat, w1bg, b1bg, w2bg, b2bg, w3bg, b3bg)
    codeC = head(image_feat, w1c, b1c, w2c, b2c, w3c, b3c)
    return image_feat, codeBG, codeC


if __name__ == "__main__":
    # Small shapes consistent with the module: image_feat = DINO patch features
    # (B, n_feats, H, W); code dim = self.dim.  (Production: n_feats=384/768.)
    B, N_FEATS, H, W = 2, 32, 16, 16
    DIM = 4

    key = jax.random.PRNGKey(0)
    ks = jax.random.split(key, 13)
    image_feat = jax.random.normal(ks[0], (B, N_FEATS, H, W), dtype=jnp.float32)

    def mk(k, shape):
        return 0.1 * jax.random.normal(k, shape, dtype=jnp.float32)

    # cluster1BG / cluster1C: Conv2d(n_feats, dim, 1x1)
    w1bg, b1bg = mk(ks[1], (DIM, N_FEATS)), mk(ks[2], (DIM,))
    w1c, b1c = mk(ks[3], (DIM, N_FEATS)), mk(ks[4], (DIM,))
    # cluster2BG / cluster2C: Conv2d(n_feats, n_feats) -> ReLU -> Conv2d(n_feats, dim)
    w2bg, b2bg = mk(ks[5], (N_FEATS, N_FEATS)), mk(ks[6], (N_FEATS,))
    w3bg, b3bg = mk(ks[7], (DIM, N_FEATS)), mk(ks[8], (DIM,))
    w2c, b2c = mk(ks[9], (N_FEATS, N_FEATS)), mk(ks[10], (N_FEATS,))
    w3c, b3c = mk(ks[11], (DIM, N_FEATS)), mk(ks[12], (DIM,))

    feat_out, codeBG, codeC = dino_featurizer_heads(
        image_feat,
        w1bg, b1bg, w2bg, b2bg, w3bg, b3bg,
        w1c, b1c, w2c, b2c, w3c, b3c)
    jax.block_until_ready((feat_out, codeBG, codeC))

    feat_ref, codeBG_ref, codeC_ref = reference(
        image_feat,
        w1bg, b1bg, w2bg, b2bg, w3bg, b3bg,
        w1c, b1c, w2c, b2c, w3c, b3c)

    np.testing.assert_allclose(np.asarray(feat_out), np.asarray(feat_ref),
                               rtol=1e-5, atol=1e-5)
    np.testing.assert_allclose(np.asarray(codeBG), np.asarray(codeBG_ref),
                               rtol=1e-4, atol=1e-4)
    np.testing.assert_allclose(np.asarray(codeC), np.asarray(codeC_ref),
                               rtol=1e-4, atol=1e-4)
    print("KERNEL_OK")
</pallas_src>

<mosaic_0001>
module attributes {stable_mosaic.version = 11 : i64} {
  func.func @_heads_kernel(%arg0: i32, %arg1: memref<1x32x256xf32, #tpu.memory_space<vmem>>, %arg2: memref<2x4x32xf32, #tpu.memory_space<vmem>>, %arg3: memref<2x4x1xf32, #tpu.memory_space<vmem>>, %arg4: memref<2x32x32xf32, #tpu.memory_space<vmem>>, %arg5: memref<2x32x1xf32, #tpu.memory_space<vmem>>, %arg6: memref<2x4x32xf32, #tpu.memory_space<vmem>>, %arg7: memref<2x4x1xf32, #tpu.memory_space<vmem>>, %arg8: memref<1x4x256xf32, #tpu.memory_space<vmem>>, %arg9: memref<1x4x256xf32, #tpu.memory_space<vmem>>) attributes {dimension_semantics = [#tpu.dimension_semantics<parallel>], iteration_bounds = array<i64: 2>, scalar_prefetch = 0 : i64, scratch_operands = 0 : i64, tpu.core_type = #tpu.core_type<tc>, window_params = [{transform_indices = @transform_0, window_bounds = array<i64: 1, 32, 256>}, {pipeline_mode = #tpu.pipeline_mode<synchronous>, transform_indices = @transform_1, window_bounds = array<i64: 2, 4, 32>}, {pipeline_mode = #tpu.pipeline_mode<synchronous>, transform_indices = @transform_2, window_bounds = array<i64: 2, 4, 1>}, {pipeline_mode = #tpu.pipeline_mode<synchronous>, transform_indices = @transform_3, window_bounds = array<i64: 2, 32, 32>}, {pipeline_mode = #tpu.pipeline_mode<synchronous>, transform_indices = @transform_4, window_bounds = array<i64: 2, 32, 1>}, {pipeline_mode = #tpu.pipeline_mode<synchronous>, transform_indices = @transform_5, window_bounds = array<i64: 2, 4, 32>}, {pipeline_mode = #tpu.pipeline_mode<synchronous>, transform_indices = @transform_6, window_bounds = array<i64: 2, 4, 1>}, {transform_indices = @transform_7, window_bounds = array<i64: 1, 4, 256>}, {transform_indices = @transform_8, window_bounds = array<i64: 1, 4, 256>}]} {
    %c0 = arith.constant 0 : index
    %c0_0 = arith.constant 0 : index
    %c0_1 = arith.constant 0 : index
    %0 = vector.load %arg1[%c0, %c0_0, %c0_1] : memref<1x32x256xf32, #tpu.memory_space<vmem>>, vector<1x32x256xf32>
    %1 = vector.shape_cast %0 : vector<1x32x256xf32> to vector<32x256xf32>
    %c0_2 = arith.constant 0 : index
    %c0_3 = arith.constant 0 : index
    %c0_4 = arith.constant 0 : index
    %2 = vector.load %arg2[%c0_2, %c0_3, %c0_4] : memref<2x4x32xf32, #tpu.memory_space<vmem>>, vector<1x4x32xf32>
    %3 = vector.shape_cast %2 : vector<1x4x32xf32> to vector<4x32xf32>
    %cst = arith.constant dense<0.000000e+00> : vector<4x256xf32>
    %4 = tpu.matmul %3, %1, %cst {dimension_numbers = #tpu.dot_dimension_numbers<[1], [0], [0], [1], [0, 0, 1, 1], [], []>} : vector<4x32xf32>, vector<32x256xf32>, vector<4x256xf32> -> vector<4x256xf32>
    %c0_5 = arith.constant 0 : index
    %c0_6 = arith.constant 0 : index
    %c0_7 = arith.constant 0 : index
    %5 = vector.load %arg3[%c0_5, %c0_6, %c0_7] : memref<2x4x1xf32, #tpu.memory_space<vmem>>, vector<1x4x1xf32>
    %6 = vector.shape_cast %5 : vector<1x4x1xf32> to vector<4x1xf32>
    %7 = vector.broadcast %6 : vector<4x1xf32> to vector<4x256xf32>
    %8 = arith.addf %4, %7 : vector<4x256xf32>
    %c0_8 = arith.constant 0 : index
    %c0_9 = arith.constant 0 : index
    %c0_10 = arith.constant 0 : index
    %9 = vector.load %arg4[%c0_8, %c0_9, %c0_10] : memref<2x32x32xf32, #tpu.memory_space<vmem>>, vector<1x32x32xf32>
    %10 = vector.shape_cast %9 : vector<1x32x32xf32> to vector<32x32xf32>
    %cst_11 = arith.constant dense<0.000000e+00> : vector<32x256xf32>
    %11 = tpu.matmul %10, %1, %cst_11 {dimension_numbers = #tpu.dot_dimension_numbers<[1], [0], [0], [1], [0, 0, 1, 1], [], []>} : vector<32x32xf32>, vector<32x256xf32>, vector<32x256xf32> -> vector<32x256xf32>
    %c0_12 = arith.constant 0 : index
    %c0_13 = arith.constant 0 : index
    %c0_14 = arith.constant 0 : index
    %12 = vector.load %arg5[%c0_12, %c0_13, %c0_14] : memref<2x32x1xf32, #tpu.memory_space<vmem>>, vector<1x32x1xf32>
    %13 = vector.shape_cast %12 : vector<1x32x1xf32> to vector<32x1xf32>
    %14 = vector.broadcast %13 : vector<32x1xf32> to vector<32x256xf32>
    %15 = arith.addf %11, %14 : vector<32x256xf32>
    %cst_15 = arith.constant 0.000000e+00 : f32
    %16 = vector.broadcast %cst_15 : f32 to vector<32x256xf32>
    %17 = arith.maximumf %15, %16 : vector<32x256xf32>
    %c0_16 = arith.constant 0 : index
    %c0_17 = arith.constant 0 : index
    %c0_18 = arith.constant 0 : index
    %18 = vector.load %arg6[%c0_16, %c0_17, %c0_18] : memref<2x4x32xf32, #tpu.memory_space<vmem>>, vector<1x4x32xf32>
    %19 = vector.shape_cast %18 : vector<1x4x32xf32> to vector<4x32xf32>
    %cst_19 = arith.constant dense<0.000000e+00> : vector<4x256xf32>
    %20 = tpu.matmul %19, %17, %cst_19 {dimension_numbers = #tpu.dot_dimension_numbers<[1], [0], [0], [1], [0, 0, 1, 1], [], []>} : vector<4x32xf32>, vector<32x256xf32>, vector<4x256xf32> -> vector<4x256xf32>
    %c0_20 = arith.constant 0 : index
    %c0_21 = arith.constant 0 : index
    %c0_22 = arith.constant 0 : index
    %21 = vector.load %arg7[%c0_20, %c0_21, %c0_22] : memref<2x4x1xf32, #tpu.memory_space<vmem>>, vector<1x4x1xf32>
    %22 = vector.shape_cast %21 : vector<1x4x1xf32> to vector<4x1xf32>
    %23 = vector.broadcast %22 : vector<4x1xf32> to vector<4x256xf32>
    %24 = arith.addf %20, %23 : vector<4x256xf32>
    %25 = arith.addf %8, %24 : vector<4x256xf32>
    %c0_23 = arith.constant 0 : index
    %c0_24 = arith.constant 0 : index
    %c0_25 = arith.constant 0 : index
    %26 = vector.load %arg8[%c0_23, %c0_24, %c0_25] : memref<1x4x256xf32, #tpu.memory_space<vmem>>, vector<1x4x256xf32>
    %27 = vector.shape_cast %26 : vector<1x4x256xf32> to vector<4x256xf32>
    %28 = vector.shape_cast %25 : vector<4x256xf32> to vector<1x4x256xf32>
    tpu.vector_store %arg8[%c0_23, %c0_24, %c0_25], %28 {strides = array<i32>} : memref<1x4x256xf32, #tpu.memory_space<vmem>>, vector<1x4x256xf32>,
    %c1 = arith.constant 1 : index
    %c0_26 = arith.constant 0 : index
    %c0_27 = arith.constant 0 : index
    %29 = vector.load %arg2[%c1, %c0_26, %c0_27] : memref<2x4x32xf32, #tpu.memory_space<vmem>>, vector<1x4x32xf32>
    %30 = vector.shape_cast %29 : vector<1x4x32xf32> to vector<4x32xf32>
    %cst_28 = arith.constant dense<0.000000e+00> : vector<4x256xf32>
    %31 = tpu.matmul %30, %1, %cst_28 {dimension_numbers = #tpu.dot_dimension_numbers<[1], [0], [0], [1], [0, 0, 1, 1], [], []>} : vector<4x32xf32>, vector<32x256xf32>, vector<4x256xf32> -> vector<4x256xf32>
    %c1_29 = arith.constant 1 : index
    %c0_30 = arith.constant 0 : index
    %c0_31 = arith.constant 0 : index
    %32 = vector.load %arg3[%c1_29, %c0_30, %c0_31] : memref<2x4x1xf32, #tpu.memory_space<vmem>>, vector<1x4x1xf32>
    %33 = vector.shape_cast %32 : vector<1x4x1xf32> to vector<4x1xf32>
    %34 = vector.broadcast %33 : vector<4x1xf32> to vector<4x256xf32>
    %35 = arith.addf %31, %34 : vector<4x256xf32>
    %c1_32 = arith.constant 1 : index
    %c0_33 = arith.constant 0 : index
    %c0_34 = arith.constant 0 : index
    %36 = vector.load %arg4[%c1_32, %c0_33, %c0_34] : memref<2x32x32xf32, #tpu.memory_space<vmem>>, vector<1x32x32xf32>
    %37 = vector.shape_cast %36 : vector<1x32x32xf32> to vector<32x32xf32>
    %cst_35 = arith.constant dense<0.000000e+00> : vector<32x256xf32>
    %38 = tpu.matmul %37, %1, %cst_35 {dimension_numbers = #tpu.dot_dimension_numbers<[1], [0], [0], [1], [0, 0, 1, 1], [], []>} : vector<32x32xf32>, vector<32x256xf32>, vector<32x256xf32> -> vector<32x256xf32>
    %c1_36 = arith.constant 1 : index
    %c0_37 = arith.constant 0 : index
    %c0_38 = arith.constant 0 : index
    %39 = vector.load %arg5[%c1_36, %c0_37, %c0_38] : memref<2x32x1xf32, #tpu.memory_space<vmem>>, vector<1x32x1xf32>
    %40 = vector.shape_cast %39 : vector<1x32x1xf32> to vector<32x1xf32>
    %41 = vector.broadcast %40 : vector<32x1xf32> to vector<32x256xf32>
    %42 = arith.addf %38, %41 : vector<32x256xf32>
    %cst_39 = arith.constant 0.000000e+00 : f32
    %43 = vector.broadcast %cst_39 : f32 to vector<32x256xf32>
    %44 = arith.maximumf %42, %43 : vector<32x256xf32>
    %c1_40 = arith.constant 1 : index
    %c0_41 = arith.constant 0 : index
    %c0_42 = arith.constant 0 : index
    %45 = vector.load %arg6[%c1_40, %c0_41, %c0_42] : memref<2x4x32xf32, #tpu.memory_space<vmem>>, vector<1x4x32xf32>
    %46 = vector.shape_cast %45 : vector<1x4x32xf32> to vector<4x32xf32>
    %cst_43 = arith.constant dense<0.000000e+00> : vector<4x256xf32>
    %47 = tpu.matmul %46, %44, %cst_43 {dimension_numbers = #tpu.dot_dimension_numbers<[1], [0], [0], [1], [0, 0, 1, 1], [], []>} : vector<4x32xf32>, vector<32x256xf32>, vector<4x256xf32> -> vector<4x256xf32>
    %c1_44 = arith.constant 1 : index
    %c0_45 = arith.constant 0 : index
    %c0_46 = arith.constant 0 : index
    %48 = vector.load %arg7[%c1_44, %c0_45, %c0_46] : memref<2x4x1xf32, #tpu.memory_space<vmem>>, vector<1x4x1xf32>
    %49 = vector.shape_cast %48 : vector<1x4x1xf32> to vector<4x1xf32>
    %50 = vector.broadcast %49 : vector<4x1xf32> to vector<4x256xf32>
    %51 = arith.addf %47, %50 : vector<4x256xf32>
    %52 = arith.addf %35, %51 : vector<4x256xf32>
    %c0_47 = arith.constant 0 : index
    %c0_48 = arith.constant 0 : index
    %c0_49 = arith.constant 0 : index
    %53 = vector.load %arg9[%c0_47, %c0_48, %c0_49] : memref<1x4x256xf32, #tpu.memory_space<vmem>>, vector<1x4x256xf32>
    %54 = vector.shape_cast %53 : vector<1x4x256xf32> to vector<4x256xf32>
    %55 = vector.shape_cast %52 : vector<4x256xf32> to vector<1x4x256xf32>
    tpu.vector_store %arg9[%c0_47, %c0_48, %c0_49], %55 {strides = array<i32>} : memref<1x4x256xf32, #tpu.memory_space<vmem>>, vector<1x4x256xf32>,
    return
  }
  func.func @transform_0(%arg0: i32) -> (i32, i32, i32) {
    %c0_i32 = arith.constant 0 : i32
    %c0_i32_0 = arith.constant 0 : i32
    %c0_i32_1 = arith.constant 0 : i32
    return %arg0, %c0_i32, %c0_i32_0 : i32, i32, i32
  }
  func.func @transform_1(%arg0: i32) -> (i32, i32, i32) {
    %c0_i32 = arith.constant 0 : i32
    %c0_i32_0 = arith.constant 0 : i32
    %c0_i32_1 = arith.constant 0 : i32
    %c0_i32_2 = arith.constant 0 : i32
    return %c0_i32, %c0_i32_0, %c0_i32_1 : i32, i32, i32
  }
  func.func @transform_2(%arg0: i32) -> (i32, i32, i32) {
    %c0_i32 = arith.constant 0 : i32
    %c0_i32_0 = arith.constant 0 : i32
    %c0_i32_1 = arith.constant 0 : i32
    %c0_i32_2 = arith.constant 0 : i32
    return %c0_i32, %c0_i32_0, %c0_i32_1 : i32, i32, i32
  }
  func.func @transform_3(%arg0: i32) -> (i32, i32, i32) {
    %c0_i32 = arith.constant 0 : i32
    %c0_i32_0 = arith.constant 0 : i32
    %c0_i32_1 = arith.constant 0 : i32
    %c0_i32_2 = arith.constant 0 : i32
    return %c0_i32, %c0_i32_0, %c0_i32_1 : i32, i32, i32
  }
  func.func @transform_4(%arg0: i32) -> (i32, i32, i32) {
    %c0_i32 = arith.constant 0 : i32
    %c0_i32_0 = arith.constant 0 : i32
    %c0_i32_1 = arith.constant 0 : i32
    %c0_i32_2 = arith.constant 0 : i32
    return %c0_i32, %c0_i32_0, %c0_i32_1 : i32, i32, i32
  }
  func.func @transform_5(%arg0: i32) -> (i32, i32, i32) {
    %c0_i32 = arith.constant 0 : i32
    %c0_i32_0 = arith.constant 0 : i32
    %c0_i32_1 = arith.constant 0 : i32
    %c0_i32_2 = arith.constant 0 : i32
    return %c0_i32, %c0_i32_0, %c0_i32_1 : i32, i32, i32
  }
  func.func @transform_6(%arg0: i32) -> (i32, i32, i32) {
    %c0_i32 = arith.constant 0 : i32
    %c0_i32_0 = arith.constant 0 : i32
    %c0_i32_1 = arith.constant 0 : i32
    %c0_i32_2 = arith.constant 0 : i32
    return %c0_i32, %c0_i32_0, %c0_i32_1 : i32, i32, i32
  }
  func.func @transform_7(%arg0: i32) -> (i32, i32, i32) {
    %c0_i32 = arith.constant 0 : i32
    %c0_i32_0 = arith.constant 0 : i32
    %c0_i32_1 = arith.constant 0 : i32
    return %arg0, %c0_i32, %c0_i32_0 : i32, i32, i32
  }
  func.func @transform_8(%arg0: i32) -> (i32, i32, i32) {
    %c0_i32 = arith.constant 0 : i32
    %c0_i32_0 = arith.constant 0 : i32
    %c0_i32_1 = arith.constant 0 : i32
    return %arg0, %c0_i32, %c0_i32_0 : i32, i32, i32
  }
}

</mosaic_0001>

<bundles_post_ra>
// kernel: tpu_custom_call.1
= control target key start
LH: loop header
LB: loop body
LE: loop exit
PB: predicated region body
PF: predicated region fallthrough
CT: control target
= control target key end

     0   :  { %14 = vsyncpa [#allocation3], 0  ;;  %s1760_s0 = inlined_call_operand.hbm [shape: f32[2,32,256], index: 0, kind: input, shape index: {}]   ;;  %s1761_s1 = inlined_call_operand.vmem [shape: f32[2,4,32], index: 1, kind: input, shape index: {}]   ;;  %s1762_s2 = inlined_call_operand.vmem [shape: f32[2,4,1], index: 2, kind: input, shape index: {}]   ;;  %s1763_s3 = inlined_call_operand.vmem [shape: f32[2,32,32], index: 3, kind: input, shape index: {}]   ;;  %s1764_s4 = inlined_call_operand.vmem [shape: f32[2,32,1], index: 4, kind: input, shape index: {}]   ;;  %s1765_s5 = inlined_call_operand.vmem [shape: f32[2,4,32], index: 5, kind: input, shape index: {}]   ;;  %s1766_s6 = inlined_call_operand.vmem [shape: f32[2,4,1], index: 6, kind: input, shape index: {}]   ;;  %s1767_s7 = inlined_call_operand.hbm [shape: f32[2,4,256], index: 7, kind: output, shape index: {0}]   ;;  %s1768_s8 = inlined_call_operand.hbm [shape: f32[2,4,256], index: 8, kind: output, shape index: {1}]  }
   0x1   :  { %16 = vsyncpa [#allocation3 + $0x1], 0 }
   0x2   :  { %17 = vsyncpa [#allocation4], 0 }
   0x3   :  { %19 = vsyncpa [#allocation4 + $0x1], 0 }
   0x4   :  { %20 = vsyncpa [#allocation7], 0 }
   0x5   :  { %22 = vsyncpa [#allocation7 + $0x1], 0  ;;  %s1442_s27 = smov 0   ;;  %s1444_s28 = smov 0  }
   0x6   :  { %s1446_s29 = smov 0   ;;  %s1448_s30 = smov 0  }
   0x7 LB: > { %s1463_s9 = sadd.s32 4294967295, %s1388_s30   ;;  %s1098_s10 = sadd.s32 4294967294, %s1388_s30   ;;  %s1388_s30 = sphi %s1448_s30, %s1783_s30   ;;  %s1384_s29 = sphi %s1446_s29, %s1782_s29   ;;  %s1380_s28 = sphi %s1444_s28, %s1781_s28   ;;  %s1376_s27 = sphi %s1442_s27, %s1780_s27  }
   0x8   : > { %s1467_s11 = sadd.s32 1, %s1388_s30   ;;  %s35_s12 = sadd.s32 1, %s1384_s29 }
   0x9   : > { %s32_s13 = ssub.s32 %s1388_s30, %s1467_s11  ;;  %p42_p0 = scmp.ne.s32.totalorder %s1384_s29, %s1380_s28 }
   0xa   : > { %p33_p1 = scmp.eq.s32.totalorder %s32_s13, 0  ;;  %p43_p2 = scmp.eq.s32.totalorder %s1388_s30, 0 }
   0xb   : > { %p48_p3 = scmp.ne.s32.totalorder %s1380_s28, %s1376_s27  ;;  %p49_p4 = scmp.eq.s32.totalorder %s1463_s9, 0 }
   0xc   : > { %s1479_s14 = scalar_select %p33_p1, %s1384_s29, %s35_s12  }
   0xd   : > { %p1481_p5 = por %p43_p2, %p42_p0  ;;  %p1485_p6 = por %p49_p4, %p48_p3 }
   0xe   : > { %p198_p7 = scmp.eq.s32.totalorder %s1463_s9, 1  ;;  %p204_p8 = scmp.eq.s32.totalorder %s1098_s10, 1 }
   0xf   : > { %p1220_p10 = scmp.lt.s32.totalorder %s1388_s30, 2  ;;  %s268_s19 = sand.u32 1, %s1384_s29  }
  0x10   : > { %p1492_p11 = por %p198_p7, %p42_p0  ;;  %p1496_p12 = por %p204_p8, %p48_p3 }
  0x11   : > { %s1140_s20 = sshll.u32 %s1388_s30, 10  ;;  %s1101_s21 = sshll.u32 %s268_s19, 6 }
  0x12   : > { %s1773_s17 = scalar_select %p1492_p11, 1, 0 }
  0x13   : > { %s1774_s18 = scalar_select %p1496_p12, 1, 0 }
  0x14   : > { %s1505_s24 = scalar_lea.hbm %s1760_s0, %s1140_s20  ;;  %s272_s25 = scalar_lea.vmem [#allocation2], %s1101_s21 }
  0x15   : > { %s279_s26 = sshll.u32 %s272_s25, 4  ;;  %p1509_p13 = pnand %p1220_p10, %p1481_p5  ;;  %s1513_s26 = int_to_ptr.vmem [resolvable:$true] %s279_s26 }
  0x16   : > { %s1515_s12 = scalar_lea.sflag [#allocation3], %s268_s19  ;;  %s1260_s13 = scalar_lea.hbm %s1505_s24, 1024 }
  0x17   : > { %p1261_p0 = scmp.ne.s32.totalorder %s1505_s24, %s1260_s13  ;;  %p1262_p1 = pneg %p1509_p13 }
  0x18   : > { %s1265_s21 = scalar_lea.hbm %s1760_s0, 2048  ;;  %p1266_p4 = scmp.lt.u32.totalorder %s1505_s24, %s1760_s0 }
  0x19   : > { %p1263_p2 = pnand %p1262_p1, %p1261_p0  ;;  %p1267_p5 = scmp.lt.u32.totalorder %s1265_s21, %s1260_s13 }
  0x1a   : > { %p1269_p8 = scmp.lt.u32.totalorder %s1260_s13, %s1505_s24 }
  0x1b   : > { %p1264_p3 = pneg %p1263_p2  ;;  %p1268_p7 = por %p1267_p5, %p1266_p4 }
  0x1d   : > { %p1270_p10 = por %p1269_p8, %p1268_p7 }
  0x1f   : > { %p1271_p9 = pnand %p1270_p10, %p1264_p3 }
  0x21   : > { %1274 = shalt.err (!%p1271_p9)
}
  0x22   : > { %s1275_s19 = scalar_lea.vmem %s1513_s26, 1024  ;;  %s1390_s25 = smov [#allocation2]  }
  0x23   : > { %p1276_p0 = scmp.ne.s32.totalorder %s1513_s26, %s1275_s19  ;;  %s1280_s20 = sshll.u32 %s1390_s25, 4  ;;  %s1281_s20 = int_to_ptr.vmem [resolvable:$false] %s1280_s20 }
  0x24   : > { %s1282_s15 = scalar_lea.vmem %s1281_s20, 2048  ;;  %p1283_p11 = scmp.lt.s32.totalorder %s1513_s26, %s1281_s20 }
  0x25   : > { %p1278_p2 = pnand %p1276_p0, %p1262_p1  ;;  %p1284_p4 = scmp.lt.s32.totalorder %s1282_s15, %s1275_s19 }
  0x27   : > { %p1279_p12 = pneg %p1278_p2  ;;  %p1285_p5 = por %p1284_p4, %p1283_p11 }
  0x29   : > { %p1286_p7 = pnand %p1285_p5, %p1279_p12 }
  0x2b   : > { %1289 = shalt.err (!%p1286_p7)
}
  0x2c   : > { %s1391_s13 = smov 256   ;;  %s1392_s21 = smov 16  }
  0x2d   : > { %1212 = dma.hbm_to_vmem [thread:$0]  (!%p1509_p13), %s1505_s24, 1024, %s1513_s26, %s1515_s12, %s1391_s13, %s1391_s13, %s1392_s21  }
  0x2e   : > { %p1104_p9 = scmp.ge.s32.totalorder %s1388_s30, 1  ;;  %p287_p1 = scmp.lt.s32.totalorder %s1388_s30, 3 }
  0x30   : > { %p288_p3 = pnand %p1104_p9, %p287_p1 }
  0x31   : > { %s1546_s22 = sand.u32 (!%p288_p3), 1, %s1380_s28  }
  0x32   : > { %291 = sbr.rel (%p288_p3) target bundleno = 560 (0x230), region = 48  ;;  %s1105_s23 = sshll.u32 (!%p288_p3), %s1546_s22, 6 }
  0x33   : > { %s294_s19 = scalar_lea.sflag (!%p288_p3), [#allocation3], %s1546_s22  ;;  %s297_s25 = scalar_lea.vmem (!%p288_p3), [#allocation2], %s1105_s23 }
  0x39   : > { %1363 = dma.done.wait (%p1485_p6), %s294_s19, 1024  }
  0x3a   : > { %1365 = vsyncadd (%p1485_p6), %s294_s19, 4294966272  ;;  %v1393_v0 = vmov 0.0   ;;  %v1394_v1 = vmov 0   ;;  %v336_v2 = vld [vmem:[%s297_s25 + $0x8] sm:$0xff]  ;;  %v338_v3 = vld [vmem:[%s297_s25 + $0x18] sm:$0xff]  ;;  %vm350_vm0 = vcmask 261120  }
  0x3b   : > { %529 = vmatprep.mubr.f32.mxu1 %v1393_v0  ;;  %1259 = vset.pattern.permute.xlu1 %v1394_v1  ;;  %v335_v4 = vld [vmem:[%s297_s25] sm:$0xff]  ;;  %v1556_v5 = vpack.c.bf16 %v338_v3, %v336_v2  ;;  %v337_v6 = vld [vmem:[%s297_s25 + $0x10] sm:$0xff]  ;;  %v340_v7 = vld [vmem:[%s297_s25 + $0x28] sm:$0xff]  ;;  %s1106_s16 = sshll.u32 %s1546_s22, 3  ;;  %s1770_s24 = sshll.u32 %s1463_s9, 7 }
  0x3c   : > { %1258 = vset.pattern.permute.xlu0 %v1394_v1  ;;  %418 = vmatprep.mubr.f32.mxu0 %v1393_v0  ;;  %v342_v8 = vld [vmem:[%s297_s25 + $0x38] sm:$0xff]  ;;  %v1558_v9 = vpack.c.bf16 %v337_v6, %v335_v4  ;;  %v339_v11 = vld [vmem:[%s297_s25 + $0x20] sm:$0xff]  ;;  %v341_v12 = vld [vmem:[%s297_s25 + $0x30] sm:$0xff]  ;;  %s327_s26 = scalar_lea.vmem [#allocation5], %s1106_s16  ;;  %s1683_s15 = scalar_lea.hbm %s1767_s7, %s1770_s24 }
  0x3d   : > { %v1560_v10 = vpack.c.bf16 %v342_v8, %v340_v7  ;;  %1152 = vmatprep.subr.bf16.mxu1 %v1556_v5  ;;  %1144 = vmatprep.subr.bf16.mxu0 %v1556_v5  ;;  %v1565_v13 = vpack.c.bf16 %v341_v12, %v339_v11  ;;  %v431_v14 = vld [vmem:[%s1764_s4 + $0x10] sm:$0xff]  ;;  %v429_v15 = vld [vmem:[%s1764_s4] sm:$0xff]  ;;  %v432_v16 = vld [vmem:[%s1764_s4 + $0x18] sm:$0xff]  ;;  %s982_s10 = sshll.u32 %s327_s26, 4  ;;  %s963_s13 = scalar_lea.sflag [#allocation4], %s1546_s22  ;;  %s1685_s10 = int_to_ptr.vmem [resolvable:$true] %s982_s10 }
  0x3e   : > { %1154 = vmatpush1.bf16.msra.mxu1 %v1558_v9  ;;  %1146 = vmatpush1.bf16.msra.mxu0 %v1558_v9  ;;  %v430_v17 = vld [vmem:[%s1764_s4 + $0x8] sm:$0xff]  ;;  %v425_v18 = vld [vmem:[%s1763_s3] sm:$0xff]  ;;  %v1124_v22 = vld [vmem:[%s1764_s4 + $0x38] sm:$0xff]  ;;  %s1290_s21 = scalar_lea.vmem %s1685_s10, 128  ;;  %p1776_p11 = scmp.ne.s32.totalorder %s1773_s17, 0 }
  0x3f   : > { %1156 = vmatprep.subr.bf16.mxu1 %v1560_v10  ;;  %1148 = vmatprep.subr.bf16.mxu0 %v1560_v10  ;;  %v1122_v19 = vld [vmem:[%s1764_s4 + $0x28] sm:$0xff]  ;;  %v1121_v20 = vld [vmem:[%s1764_s4 + $0x20] sm:$0xff]  ;;  %v1123_v23 = vld [vmem:[%s1764_s4 + $0x30] sm:$0xff]  ;;  %p1291_p6 = scmp.ne.s32.totalorder %s1685_s10, %s1290_s21  ;;  %s1395_s23 = smov [#allocation5]  }
  0x40   : > { %445 = vperm.xlu1 %1259, %v431_v14   ;;  %435 = vperm.xlu0 %1258, %v429_v15   ;;  %v426_v21 = vld [vmem:[%s1763_s3 + $0x8] sm:$0xff]  ;;  %v427_v24 = vld [vmem:[%s1763_s3 + $0x10] sm:$0xff]  ;;  %v563_v25 = vld [vmem:[%s1766_s6] sm:$0xf]  ;;  %s1294_s19 = sshll.u32 %s1395_s23, 4  ;;  %s1295_s19 = int_to_ptr.vmem [resolvable:$false] %s1294_s19 }
  0x41   : > { %v344_v26 = vld [vmem:[%s1762_s2] sm:$0xf]  ;;  %v428_v27 = vld [vmem:[%s1763_s3 + $0x18] sm:$0xff]  ;;  %v1130_v28 = vld [vmem:[%s1766_s6 + $0x4] sm:$0xf]  ;;  %p1292_p12 = pnand %p1291_p6, %p1776_p11  ;;  %s1296_s25 = scalar_lea.vmem %s1295_s19, 256 }
  0x42   : > { %1158 = vmatpush1.bf16.msra.mxu1 %v1565_v13  ;;  %1150 = vmatpush1.bf16.msra.mxu0 %v1565_v13  ;;  %v1115_v29 = vld [vmem:[%s1762_s2 + $0x4] sm:$0xf]  ;;  %v1118_v31 = vld [vmem:[%s1763_s3 + $0x28] sm:$0xff]  ;;  %v1119_v32 = vld [vmem:[%s1763_s3 + $0x30] sm:$0xff]  ;;  %p1297_p8 = scmp.lt.s32.totalorder %s1685_s10, %s1295_s19  ;;  %p1298_p10 = scmp.lt.s32.totalorder %s1296_s25, %s1290_s21 }
  0x43   : > { %1176 = vmatprep.subr.bf16.mxu1 %v1556_v5  ;;  %v1117_v30 = vld [vmem:[%s1763_s3 + $0x20] sm:$0xff]  ;;  %v1120_v33 = vld [vmem:[%s1763_s3 + $0x38] sm:$0xff]  ;;  %p1293_p13 = pneg %p1292_p12 }
  0x44   : > { %450 = vperm.xlu1 %1259, %v432_v16   ;;  %440 = vperm.xlu0 %1258, %v430_v17   ;;  %v343_v34 = vld [vmem:[%s1761_s1] sm:$0xf]  ;;  %p1299_p0 = por %p1298_p10, %p1297_p8 }
  0x45   : > { %1109 = vmatmul.mubr.msk.f32.vlgmr.msra.gmra.mrb[0].mxu1 %vm350_vm0, %v425_v18  ;;  %1108 = vmatmul.mubr.msk.f32.vlgmr.msra.gmra.mrb[0].mxu0 %vm350_vm0, %v343_v34  ;;  %v562_v17 = vld [vmem:[%s1765_s5] sm:$0xf] }
  0x46   : > { %1178 = vmatpush1.bf16.msra.mxu1 %v1558_v9  ;;  %535 = vmatprep.mubr.f32.mxu1 %v1393_v0  ;;  %p1300_p2 = pnand %p1299_p0, %p1293_p13 }
  0x47   : > { %1180 = vmatprep.subr.bf16.mxu1 %v1560_v10  ;;  %636 = vmatprep.mubr.f32.mxu0 %v1393_v0 }
  0x48   : > { %750 = vperm.xlu1 %1259, %v1122_v19   ;;  %745 = vperm.xlu0 %1258, %v1121_v20  }
  0x49   : > { %1110 = vmatmul.mubr.msk.f32.gmra.mrb[2].mxu1 %vm350_vm0, %v426_v21 }
  0x4a   : > { %541 = vmatprep.mubr.f32.mxu1 %v1393_v0  ;;  %1182 = vmatpush1.bf16.msra.mxu1 %v1565_v13 }
  0x4c   : > { %760 = vperm.xlu1 %1259, %v1124_v22   ;;  %755 = vperm.xlu0 %1258, %v1123_v23  }
  0x4d   : > { %1111 = vmatmul.mubr.msk.f32.gmra.mrb[4].mxu1 %vm350_vm0, %v427_v24 }
  0x4e   : > { %547 = vmatprep.mubr.f32.mxu1 %v1393_v0 }
  0x50   : > { %566 = vperm.xlu1 %1259, %v563_v25   ;;  %347 = vperm.xlu0 %1258, %v344_v26  }
  0x51   : > { %1112 = vmatmul.mubr.msk.f32.gmra.mrb[6].mxu1 %vm350_vm0, %v428_v27 }
  0x52   : > { %839 = vmatprep.mubr.f32.mxu1 %v1393_v0 }
  0x54   : > { %878 = vperm.xlu1 %1259, %v1130_v28   ;;  %656 = vperm.xlu0 %1258, %v1115_v29  }
  0x55   : > { %1125 = vmatmul.mubr.msk.f32.vlgmr.msra.gmra.mrb[8].mxu1 %vm350_vm0, %v1117_v30 }
  0x56   : > { %845 = vmatprep.mubr.f32.mxu1 %v1393_v0 }
  0x59   : > { %1126 = vmatmul.mubr.msk.f32.gmra.mrb[10].mxu1 %vm350_vm0, %v1118_v31 }
  0x5a   : > { %851 = vmatprep.mubr.f32.mxu1 %v1393_v0 }
  0x5d   : > { %1127 = vmatmul.mubr.msk.f32.gmra.mrb[12].mxu1 %vm350_vm0, %v1119_v32 }
  0x5e   : > { %857 = vmatprep.mubr.f32.mxu1 %v1393_v0 }
  0x61   : > { %1128 = vmatmul.mubr.msk.f32.gmra.mrb[14].mxu1 %vm350_vm0, %v1120_v33  ;;  %v1114_v33 = vld [vmem:[%s1761_s1 + $0x4] sm:$0xf] }
  0xbf   : > { %v436_v35 = vpop.permute.xlu0 %435  ;;  %v446_v44 = vpop.permute.xlu1 %445 }
  0xc3   : > { %v441_v39 = vpop.permute.xlu0 %440  ;;  %v451_v55 = vpop.permute.xlu1 %450 }
  0xc7   : > { %v746_v6 = vpop.permute.xlu0 %745  ;;  %v751_v11 = vpop.permute.xlu1 %750 }
  0xcb   : > { %v756_v26 = vpop.permute.xlu0 %755  ;;  %v761_v29 = vpop.permute.xlu1 %760 }
 0x118   : > { %v531_v36 = vpop.f32.mrb[0].mxu1 }
 0x119   : > { %v533_v37 = vpop.f32.mrb[1].mxu1  ;;  %v532_v38 = vadd.f32 %v531_v36, %v436_v35 }
 0x11a   : > { %v534_v40 = vadd.f32 %v533_v37, %v436_v35 }
 0x11b   : > { %v554_v46 = vmax.f32 %v532_v38, 0.0  ;;  %v1129_v38 = vld [vmem:[%s1765_s5 + $0x4] sm:$0xf] }
 0x11c   : > { %v537_v41 = vpop.f32.mrb[2].mxu1  ;;  %v555_v48 = vmax.f32 %v534_v40, 0.0  ;;  %v348_v40 = vpop.permute.xlu0 %347 }
 0x11d   : > { %v538_v42 = vadd.f32 %v537_v41, %v441_v39  ;;  %v539_v43 = vpop.f32.mrb[3].mxu1 }
 0x11e   : > { %v540_v45 = vadd.f32 %v539_v43, %v441_v39  ;;  %v567_v39 = vpop.permute.xlu1 %566 }
 0x11f   : > { %v556_v47 = vmax.f32 %v538_v42, 0.0  ;;  %v1191_v41 = vadd.f32 %v567_v39, %v348_v40 }
 0x120   : > { %v557_v49 = vmax.f32 %v540_v45, 0.0  ;;  %v543_v50 = vpop.f32.mrb[4].mxu1 }
 0x121   : > { %v1161_v51 = vpack.c.bf16 %v556_v47, %v554_v46  ;;  %v545_v52 = vpop.f32.mrb[5].mxu1  ;;  %v544_v54 = vadd.f32 %v543_v50, %v446_v44 }
 0x122   : > { %v1159_v53 = vpack.c.bf16 %v557_v49, %v555_v48  ;;  %v546_v56 = vadd.f32 %v545_v52, %v446_v44 }
 0x123   : > { %v558_v61 = vmax.f32 %v544_v54, 0.0 }
 0x124   : > { %v549_v57 = vpop.f32.mrb[6].mxu1  ;;  %1160 = vmatprep.subr.bf16.mxu0 %v1159_v53  ;;  %v559_v63 = vmax.f32 %v546_v56, 0.0 }
 0x125   : > { %v550_v58 = vadd.f32 %v549_v57, %v451_v55  ;;  %v551_v59 = vpop.f32.mrb[7].mxu1  ;;  %1162 = vmatpush1.bf16.msra.mxu0 %v1161_v51 }
 0x126   : > { %v552_v60 = vadd.f32 %v551_v59, %v451_v55 }
 0x127   : > { %v560_v62 = vmax.f32 %v550_v58, 0.0 }
 0x128   : > { %v561_v1 = vmax.f32 %v552_v60, 0.0  ;;  %v841_v2 = vpop.f32.mrb[8].mxu1 }
 0x129   : > { %v1165_v3 = vpack.c.bf16 %v560_v62, %v558_v61  ;;  %v843_v4 = vpop.f32.mrb[9].mxu1  ;;  %v842_v8 = vadd.f32 %v841_v2, %v746_v6 }
 0x12a   : > { %v1163_v7 = vpack.c.bf16 %v561_v1, %v559_v63  ;;  %v844_v12 = vadd.f32 %v843_v4, %v746_v6 }
 0x12b   : > { %v864_v19 = vmax.f32 %v842_v8, 0.0 }
 0x12c   : > { %1164 = vmatprep.subr.bf16.mxu0 %v1163_v7  ;;  %v847_v14 = vpop.f32.mrb[10].mxu1  ;;  %v865_v21 = vmax.f32 %v844_v12, 0.0 }
 0x12d   : > { %v848_v15 = vadd.f32 %v847_v14, %v751_v11  ;;  %1166 = vmatpush1.bf16.msra.mxu0 %v1165_v3  ;;  %v849_v16 = vpop.f32.mrb[11].mxu1 }
 0x12e   : > { %v850_v18 = vadd.f32 %v849_v16, %v751_v11  ;;  %1168 = vmatprep.subr.bf16.mxu0 %v1556_v5 }
 0x12f   : > { %v866_v20 = vmax.f32 %v848_v15, 0.0 }
 0x130   : > { %v867_v22 = vmax.f32 %v850_v18, 0.0  ;;  %1113 = vmatmul.mubr.msk.f32.vlgmr.msra.gmra.mrb[0].mxu0 %vm350_vm0, %v562_v17  ;;  %v853_v23 = vpop.f32.mrb[12].mxu1 }
 0x131   : > { %v1185_v24 = vpack.c.bf16 %v866_v20, %v864_v19  ;;  %1170 = vmatpush1.bf16.msra.mxu0 %v1558_v9  ;;  %v855_v25 = vpop.f32.mrb[13].mxu1  ;;  %726 = vmatprep.mubr.f32.mxu0 %v1393_v0  ;;  %v854_v28 = vadd.f32 %v853_v23, %v756_v26 }
 0x132   : > { %v1183_v27 = vpack.c.bf16 %v867_v22, %v865_v21  ;;  %1172 = vmatprep.subr.bf16.mxu0 %v1560_v10  ;;  %v856_v5 = vadd.f32 %v855_v25, %v756_v26 }
 0x133   : > { %v868_v34 = vmax.f32 %v854_v28, 0.0 }
 0x134   : > { %v859_v30 = vpop.f32.mrb[14].mxu1  ;;  %v869_v36 = vmax.f32 %v856_v5, 0.0 }
 0x135   : > { %v860_v31 = vadd.f32 %v859_v30, %v761_v29  ;;  %1174 = vmatpush1.bf16.msra.mxu0 %v1565_v13  ;;  %v861_v32 = vpop.f32.mrb[15].mxu1 }
 0x136   : > { %v862_v9 = vadd.f32 %v861_v32, %v761_v29  ;;  %1184 = vmatprep.subr.bf16.mxu0 %v1183_v27 }
 0x137   : > { %v870_v35 = vmax.f32 %v860_v31, 0.0 }
 0x138   : > { %v871_v37 = vmax.f32 %v862_v9, 0.0  ;;  %1116 = vmatmul.mubr.msk.f32.vlgmr.msra.gmra.mrb[2].mxu0 %vm350_vm0, %v1114_v33 }
 0x139   : > { %v1189_v10 = vpack.c.bf16 %v870_v35, %v868_v34  ;;  %1186 = vmatpush1.bf16.msra.mxu0 %v1185_v24  ;;  %948 = vmatprep.mubr.f32.mxu0 %v1393_v0 }
 0x13a   : > { %v1187_v13 = vpack.c.bf16 %v871_v37, %v869_v36 }
 0x13c   : > { %1188 = vmatprep.subr.bf16.mxu0 %v1187_v13 }
 0x13d   : > { %1190 = vmatpush1.bf16.msra.mxu0 %v1189_v10 }
 0x140   : > { %1131 = vmatmul.mubr.msk.f32.vlgmr.msra.gmra.mrb[2].mxu0 %vm350_vm0, %v1129_v38 }
 0x203   : > { %v638_v42 = vpop.f32.mrb[0].mxu0 }
 0x204   : > { %v1192_v43 = vadd.f32 %v1191_v41, %v638_v42  ;;  %v640_v44 = vpop.f32.mrb[1].mxu0 }
 0x205   : > { %v1194_v0 = vadd.f32 %v1191_v41, %v640_v44 }
 0x207   : > { %v647_v45 = vcombine.low %v1192_v43, %v1194_v0 }
 0x209   : > { %649 = vst [vmem:[%s327_s26] sm:$0xff] %v647_v45 }
 0x20a   : > { %1303 = shalt.err (!%p1300_p2)
}
 0x20b   : > { %s1304_s26 = scalar_lea.hbm %s1683_s15, 128  ;;  %s1308_s23 = scalar_lea.hbm %s1767_s7, 256 }
 0x20c   : > { %p1305_p4 = scmp.ne.s32.totalorder %s1683_s15, %s1304_s26  ;;  %p1309_p9 = scmp.lt.u32.totalorder %s1683_s15, %s1767_s7 }
 0x20d   : > { %p1310_p1 = scmp.lt.u32.totalorder %s1308_s23, %s1304_s26  ;;  %p1312_p6 = scmp.lt.u32.totalorder %s1304_s26, %s1683_s15 }
 0x20e   : > { %p1306_p5 = pnand %p1305_p4, %p1776_p11 }
 0x20f   : > { %p1311_p3 = por %p1310_p1, %p1309_p9 }
 0x210   : > { %p1307_p7 = pneg %p1306_p5 }
 0x211   : > { %p1313_p12 = por %p1312_p6, %p1311_p3 }
 0x213   : > { %p1314_p13 = pnand %p1313_p12, %p1307_p7 }
 0x215   : > { %1317 = shalt.err (!%p1314_p13)
}
 0x216   : > { %1205 = dma.vmem_to_hbm [thread:$0]  (%p1776_p11), %s1685_s10, 128, %s1683_s15, %s963_s13   ;;  %v879_v46 = vpop.permute.xlu1 %878  ;;  %v657_v47 = vpop.permute.xlu0 %656 }
 0x217   : > { %v1195_v48 = vadd.f32 %v879_v46, %v657_v47  ;;  %v950_v49 = vpop.f32.mrb[2].mxu0  ;;  %s334_s24 = scalar_lea.vmem [#allocation6], %s1106_s16  ;;  %s1777_s25 = sshll.u32 %s1463_s9, 7 }
 0x218   : > { %v952_v51 = vpop.f32.mrb[3].mxu0  ;;  %s996_s21 = sshll.u32 %s334_s24, 4  ;;  %s1716_s20 = scalar_lea.hbm %s1768_s8, %s1777_s25  ;;  %s1718_s21 = int_to_ptr.vmem [resolvable:$true] %s996_s21 }
 0x219   : > { %v1196_v50 = vadd.f32 %v1195_v48, %v950_v49  ;;  %v1198_v52 = vadd.f32 %v1195_v48, %v952_v51  ;;  %s968_s10 = scalar_lea.sflag [#allocation7], %s1546_s22  ;;  %s1318_s15 = scalar_lea.vmem %s1718_s21, 128 }
 0x21a   : > { %p1319_p8 = scmp.ne.s32.totalorder %s1718_s21, %s1318_s15  ;;  %s1396_s16 = smov [#allocation6]  }
 0x21b   : > { %v959_v53 = vcombine.low %v1196_v50, %v1198_v52  ;;  %s1322_s13 = sshll.u32 %s1396_s16, 4  ;;  %s1323_s13 = int_to_ptr.vmem [resolvable:$false] %s1322_s13 }
 0x21c   : > { %p1320_p10 = pnand %p1319_p8, %p1776_p11  ;;  %s1324_s9 = scalar_lea.vmem %s1323_s13, 256 }
 0x21d   : > { %961 = vst [vmem:[%s334_s24] sm:$0xff] %v959_v53  ;;  %p1325_p2 = scmp.lt.s32.totalorder %s1718_s21, %s1323_s13  ;;  %p1326_p4 = scmp.lt.s32.totalorder %s1324_s9, %s1318_s15 }
 0x21e   : > { %p1321_p0 = pneg %p1320_p10 }
 0x21f   : > { %p1327_p5 = por %p1326_p4, %p1325_p2 }
 0x221   : > { %p1328_p7 = pnand %p1327_p5, %p1321_p0 }
 0x223   : > { %1331 = shalt.err (!%p1328_p7)
}
 0x224   : > { %s1332_s22 = scalar_lea.hbm %s1716_s20, 128  ;;  %s1336_s24 = scalar_lea.hbm %s1768_s8, 256 }
 0x225   : > { %p1333_p9 = scmp.ne.s32.totalorder %s1716_s20, %s1332_s22  ;;  %p1337_p6 = scmp.lt.u32.totalorder %s1716_s20, %s1768_s8 }
 0x226   : > { %p1338_p12 = scmp.lt.u32.totalorder %s1336_s24, %s1332_s22  ;;  %p1340_p8 = scmp.lt.u32.totalorder %s1332_s22, %s1716_s20 }
 0x227   : > { %p1334_p1 = pnand %p1333_p9, %p1776_p11 }
 0x228   : > { %p1339_p13 = por %p1338_p12, %p1337_p6 }
 0x229   : > { %p1335_p3 = pneg %p1334_p1 }
 0x22a   : > { %p1341_p10 = por %p1340_p8, %p1339_p13 }
 0x22c   : > { %p1342_p0 = pnand %p1341_p10, %p1335_p3 }
 0x22e   : > { %1345 = shalt.err (!%p1342_p0)
}
 0x22f   : > { %1206 = dma.vmem_to_hbm [thread:$0]  (%p1776_p11), %s1718_s21, 128, %s1716_s20, %s968_s10  }
 0x230 PF: > { %s1008_s12 = sand.u32 1, %s1376_s27   ;;  %p1778_p2 = scmp.ne.s32.totalorder %s1774_s18, 0 }
 0x231   : > { %p1779_p4 = scmp.ge.s32.totalorder %s1388_s30, 2  ;;  %s1009_s15 = scalar_lea.sflag [#allocation4], %s1008_s12 }
 0x233   : > { %p1214_p5 = pnand %p1779_p4, %p1778_p2 }
 0x235   : > { %1367 = dma.done.wait (!%p1214_p5), %s1009_s15, 128  }
 0x236   : > { %1369 = vsyncadd (!%p1214_p5), %s1009_s15, 4294967168  ;;  %s1018_s16 = scalar_lea.sflag [#allocation7], %s1008_s12 }
 0x237   : > { %1371 = dma.done.wait (!%p1214_p5), %s1018_s16, 128  }
 0x238   : > { %1373 = vsyncadd (!%p1214_p5), %s1018_s16, 4294967168  ;;  %p25_p11 = scmp.ge.s32.totalorder %s1467_s11, 4   ;;  %s1780_s27 = smov %s1380_s28 }
 0x239   : > { %s1781_s28 = smov %s1384_s29  ;;  %s1782_s29 = smov %s1479_s14 }
 0x23a   : > { %s1783_s30 = smov %s1467_s11  ;;  %27 = sbr.rel (!%p25_p11) target bundleno = 7 (0x7), region = 116 }
 0x241   :  { %1023 = vsyncpa [#allocation3], 1 }
 0x242   :  { %1025 = vsyncpa [#allocation3 + $0x1], 1 }
 0x243   :  { %1026 = vsyncpa [#allocation4], 1 }
 0x244   :  { %1028 = vsyncpa [#allocation4 + $0x1], 1 }
 0x245   :  { %1029 = vsyncpa [#allocation7], 1 }
 0x246   :  { %1031 = vsyncpa [#allocation7 + $0x1], 1 }

</bundles_post_ra>
